<compile_context>
chip_gen: v7x
topology: tpu7x:2x2x1
jax: 0.10.0
libtpu: 0.0.40
codegen_flags: <defaults>
</compile_context>

<pallas_src>
import math

import jax
import jax.numpy as jnp
from jax.experimental import pallas as pl
from jax.experimental.pallas import tpu as pltpu


def _linear_kernel(x_ref, w_ref, o_ref):
    # x_ref: (TM, R*d_inp) packed-row tile; w_ref: (R*d_inp, R*n_pad)
    # VMEM-resident block-diagonal weight (constant block index -> fetched
    # once); o_ref: (TM, R*n_pad) lane-dense output tile.
    o_ref[...] = jnp.dot(
        x_ref[...], w_ref[...], preferred_element_type=jnp.float32
    ).astype(o_ref.dtype)


def _round_up(n, m):
    return ((n + m - 1) // m) * m


def _plan_packing(d_model):
    """Return (R, n_pad): pack R rows per kernel row, pad each row to n_pad.

    R*n_pad is always a multiple of 128 so the output BlockSpec is lane-dense.
    """
    for target in (256, 128):
        if target % d_model == 0:
            return target // d_model, d_model
    return 1, _round_up(d_model, 128)


def time_feature_embedding(x, weight, *, tm_packed=4096, out_dtype=None):
    """TimeFeatureEmbedding forward: y = x @ W.T (nn.Linear, bias=False).

    x: (B, L, d_inp); weight: (d_model, d_inp) (PyTorch layout).
    out_dtype: output dtype (defaults to x.dtype; pass jnp.bfloat16 to halve
    the dominant output HBM traffic if the surrounding model tolerates it).
    """
    B, L, d_inp = x.shape
    d_model = weight.shape[0]
    M = B * L
    out_dtype = x.dtype if out_dtype is None else out_dtype

    R, n_pad = _plan_packing(d_model)

    # Tiny weight: transpose, pad output columns if needed, block-diagonalize.
    w_t = weight.T.astype(jnp.float32)                  # (d_inp, d_model)
    if n_pad != d_model:
        w_t = jnp.pad(w_t, ((0, 0), (0, n_pad - d_model)))
    w_blk = jax.scipy.linalg.block_diag(*([w_t] * R))   # (R*d_inp, R*n_pad)

    # Pad M only to a whole sublane group of packed rows (<= 8*R - 1 rows of
    # dead traffic) -- not to a full tile.
    m_pad = _round_up(M, 8 * R)
    mp = m_pad // R                                     # packed rows, mult of 8

    x2d = x.reshape(M, d_inp)
    if m_pad != M:
        x2d = jnp.pad(x2d, ((0, m_pad - M), (0, 0)))
    xp = x2d.reshape(mp, R * d_inp)                     # free row-major pack

    # Tile selection: largest tile that fits every generation's scoped-VMEM
    # default (v5e 16 MiB is the binding one), but keep >= 2 grid steps when
    # there is enough work so the "parallel" axis shards across both v7x TCs.
    tm = min(tm_packed, _round_up(pl.cdiv(mp, 2), 8))
    grid = pl.cdiv(mp, tm)                              # last tile may be partial

    itemsize_in = jnp.dtype(x.dtype).itemsize
    itemsize_out = jnp.dtype(out_dtype).itemsize
    cost = pl.CostEstimate(
        flops=2 * mp * (R * d_inp) * (R * n_pad),
        transcendentals=0,
        bytes_accessed=(itemsize_in * m_pad * d_inp
                        + 4 * (R * d_inp) * (R * n_pad)
                        + itemsize_out * m_pad * n_pad),
    )

    out = pl.pallas_call(
        _linear_kernel,
        out_shape=jax.ShapeDtypeStruct((mp, R * n_pad), out_dtype),
        grid_spec=pltpu.PrefetchScalarGridSpec(
            num_scalar_prefetch=0,
            grid=(grid,),
            in_specs=[
                pl.BlockSpec((tm, R * d_inp), lambda i: (i, 0)),
                pl.BlockSpec((R * d_inp, R * n_pad), lambda i: (0, 0)),
            ],
            out_specs=pl.BlockSpec((tm, R * n_pad), lambda i: (i, 0)),
        ),
        compiler_params=pltpu.CompilerParams(
            dimension_semantics=("parallel",),
        ),
        cost_estimate=cost,
    )(xp, w_blk)

    # Unpack: (mp, R*n_pad) -> (m_pad, n_pad); drop pad rows / pad columns.
    y = out.reshape(m_pad, n_pad)[:M, :d_model]
    return y.reshape(B, L, d_model)


if __name__ == "__main__":
    # Module config: freq='h' -> d_inp = 4; small d_model.
    d_inp = 4
    d_model = 32

    key = jax.random.PRNGKey(0)
    kx, kw, kx2, kx3 = jax.random.split(key, 4)

    # Deterministic param init matching nn.Linear default (Kaiming uniform).
    bound = 1.0 / math.sqrt(d_inp)
    weight = jax.random.uniform(
        kw, (d_model, d_inp), minval=-bound, maxval=bound, dtype=jnp.float32
    )

    # Small shape (single-tile path; M padded only to one sublane group).
    B, L = 2, 8
    x = jax.random.normal(kx, (B, L, d_inp), dtype=jnp.float32)
    y = jax.block_until_ready(time_feature_embedding(x, weight))
    y_ref = x @ weight.T
    assert y.shape == (B, L, d_model)
    assert jnp.allclose(y, y_ref, atol=1e-5, rtol=1e-5)

    # Larger shape: multi-step grid (>= 2 steps -> both TCs on v7x).
    B2, L2 = 4, 4096
    x2 = jax.random.normal(kx2, (B2, L2, d_inp), dtype=jnp.float32)
    y2 = jax.block_until_ready(time_feature_embedding(x2, weight))
    assert y2.shape == (B2, L2, d_model)
    assert jnp.allclose(y2, x2 @ weight.T, atol=1e-5, rtol=1e-5)

    # Ragged M: exercises the partial (masked) final tile and tiny row pad.
    B3, L3 = 3, 1000
    x3 = jax.random.normal(kx3, (B3, L3, d_inp), dtype=jnp.float32)
    y3 = jax.block_until_ready(time_feature_embedding(x3, weight))
    assert y3.shape == (B3, L3, d_model)
    assert jnp.allclose(y3, x3 @ weight.T, atol=1e-5, rtol=1e-5)

    print("KERNEL_OK")
</pallas_src>

<mosaic_0001>
module attributes {stable_mosaic.version = 11 : i64} {
  func.func @_linear_kernel(%arg0: i32, %arg1: memref<8x32xf32, #tpu.memory_space<vmem>>, %arg2: memref<32x256xf32, #tpu.memory_space<vmem>>, %arg3: memref<8x256xf32, #tpu.memory_space<vmem>>) attributes {dimension_semantics = [#tpu.dimension_semantics<parallel>], iteration_bounds = array<i64: 1>, scalar_prefetch = 0 : i64, scratch_operands = 0 : i64, tpu.core_type = #tpu.core_type<tc>, window_params = [{transform_indices = @transform_0, window_bounds = array<i64: 8, 32>}, {pipeline_mode = #tpu.pipeline_mode<synchronous>, transform_indices = @transform_1, window_bounds = array<i64: 32, 256>}, {transform_indices = @transform_2, window_bounds = array<i64: 8, 256>}]} {
    %c0 = arith.constant 0 : index
    %c0_0 = arith.constant 0 : index
    %0 = vector.load %arg1[%c0, %c0_0] : memref<8x32xf32, #tpu.memory_space<vmem>>, vector<8x32xf32>
    %c0_1 = arith.constant 0 : index
    %c0_2 = arith.constant 0 : index
    %1 = vector.load %arg2[%c0_1, %c0_2] : memref<32x256xf32, #tpu.memory_space<vmem>>, vector<32x256xf32>
    %cst = arith.constant dense<0.000000e+00> : vector<8x256xf32>
    %2 = tpu.matmul %0, %1, %cst {dimension_numbers = #tpu.dot_dimension_numbers<[1], [0], [0], [1], [0, 0, 1, 1], [], []>} : vector<8x32xf32>, vector<32x256xf32>, vector<8x256xf32> -> vector<8x256xf32>
    %c0_3 = arith.constant 0 : index
    %c0_4 = arith.constant 0 : index
    %3 = vector.load %arg3[%c0_3, %c0_4] : memref<8x256xf32, #tpu.memory_space<vmem>>, vector<8x256xf32>
    tpu.vector_store %arg3[%c0_3, %c0_4], %2 {strides = array<i32>} : memref<8x256xf32, #tpu.memory_space<vmem>>, vector<8x256xf32>,
    return
  }
  func.func @transform_0(%arg0: i32) -> (i32, i32) {
    %c0_i32 = arith.constant 0 : i32
    %c0_i32_0 = arith.constant 0 : i32
    return %arg0, %c0_i32 : i32, i32
  }
  func.func @transform_1(%arg0: i32) -> (i32, i32) {
    %c0_i32 = arith.constant 0 : i32
    %c0_i32_0 = arith.constant 0 : i32
    %c0_i32_1 = arith.constant 0 : i32
    return %c0_i32, %c0_i32_0 : i32, i32
  }
  func.func @transform_2(%arg0: i32) -> (i32, i32) {
    %c0_i32 = arith.constant 0 : i32
    %c0_i32_0 = arith.constant 0 : i32
    return %arg0, %c0_i32 : i32, i32
  }
}

</mosaic_0001>

<bundles_post_ra>
// kernel: tpu_custom_call.1
= control target key start
LH: loop header
LB: loop body
LE: loop exit
PB: predicated region body
PF: predicated region fallthrough
CT: control target
= control target key end

     0   :  { %7 = vsyncpa [#allocation3], 0  ;;  %s291_s0 = inlined_call_operand.hbm [shape: f32[8,32], index: 0, kind: input, shape index: {}]   ;;  %s292_s1 = inlined_call_operand.hbm [shape: f32[32,256], index: 1, kind: input, shape index: {}]   ;;  %s293_s2 = inlined_call_operand.hbm [shape: f32[8,256], index: 2, kind: output, shape index: {}]  }
   0x1   :  { %8 = vsyncpa [#allocation6], 0 }
   0x2   :  { %9 = vsyncpa [#allocation4], 0  ;;  %s227_s9 = smov [#allocation2]   ;;  %s228_s11 = smov [#allocation5]  }
   0x3   :  { %s16_s10 = sshll.u32 %s227_s9, 4  ;;  %s25_s12 = sshll.u32 %s228_s11, 4  ;;  %s17_s10 = int_to_ptr.vmem [resolvable:$true] %s16_s10  ;;  %s248_s12 = int_to_ptr.vmem [resolvable:$true] %s25_s12 }
   0x4   :  { %s155_s15 = scalar_lea.hbm %s291_s0, 128 }
   0x5   :  { %p156_p0 = scmp.ne.s32.totalorder %s291_s0, %s155_s15  ;;  %p159_p1 = scmp.lt.u32.totalorder %s155_s15, %s291_s0 }
   0x7   :  { %p161_p2 = pnand %p159_p1, %p156_p0 }
   0x9   :  { %164 = shalt.err (!%p161_p2)
}
   0xa   :  { %s165_s20 = scalar_lea.vmem %s17_s10, 128  ;;  %p170_p4 = scmp.lt.s32.totalorder %s17_s10, %s17_s10 }
   0xb   :  { %p166_p3 = scmp.ne.s32.totalorder %s17_s10, %s165_s20  ;;  %p171_p5 = scmp.lt.s32.totalorder %s165_s20, %s165_s20 }
   0xd   :  { %p172_p6 = por %p171_p5, %p170_p4 }
   0xf   :  { %p173_p7 = pnand %p172_p6, %p166_p3 }
  0x11   :  { %176 = shalt.err (!%p173_p7)
}
  0x12   :  { %19 = dma.hbm_to_vmem [thread:$0]  %s291_s0, 128, %s17_s10, [#allocation3]  }
  0x13   :  { %s177_s25 = scalar_lea.hbm %s292_s1, 1024 }
  0x14   :  { %p178_p8 = scmp.ne.s32.totalorder %s292_s1, %s177_s25  ;;  %p181_p9 = scmp.lt.u32.totalorder %s177_s25, %s292_s1 }
  0x16   :  { %p183_p10 = pnand %p181_p9, %p178_p8 }
  0x18   :  { %186 = shalt.err (!%p183_p10)
}
  0x19   :  { %s187_s30 = scalar_lea.vmem %s248_s12, 1024  ;;  %p192_p12 = scmp.lt.s32.totalorder %s248_s12, %s248_s12 }
  0x1a   :  { %p188_p11 = scmp.ne.s32.totalorder %s248_s12, %s187_s30  ;;  %p193_p13 = scmp.lt.s32.totalorder %s187_s30, %s187_s30 }
  0x1c   :  { %p194_p0 = por %p193_p13, %p192_p12 }
  0x1e   :  { %p195_p1 = pnand %p194_p0, %p188_p11 }
  0x20   :  { %198 = shalt.err (!%p195_p1)
}
  0x21   :  { %s229_s0 = smov 256   ;;  %s230_s3 = smov 16  }
  0x22   :  { %31 = dma.hbm_to_vmem [thread:$0]  %s292_s1, 1024, %s248_s12, [#allocation6], %s229_s0, %s229_s0, %s230_s3  }
  0x23   :  { %221 = dma.done.wait [#allocation3], 128  }
  0x24   :  { %222 = vsyncadd [#allocation3], 4294967168 }
  0x25   :  { %223 = dma.done.wait [#allocation6], 1024  }
  0x26   :  { %224 = vsyncadd [#allocation6], 4294966272  ;;  %v231_v0 = vmov 0.0   ;;  %v40_v1 = vld [vmem:[#allocation5 + $0x8] sm:$0xff]  ;;  %v42_v2 = vld [vmem:[#allocation5 + $0x18] sm:$0xff]  ;;  %vm47_vm0 = vcmask 261120  }
  0x27   :  { %115 = vmatprep.mubr.f32.mxu0 %v231_v0  ;;  %v39_v3 = vld [vmem:[#allocation5] sm:$0xff]  ;;  %v141_v4 = vpack.c.bf16 %v42_v2, %v40_v1  ;;  %v41_v5 = vld [vmem:[#allocation5 + $0x10] sm:$0xff]  ;;  %v44_v6 = vld [vmem:[#allocation5 + $0x28] sm:$0xff]  ;;  %s232_s1 = smov [#allocation7]  }
  0x28   :  { %v46_v7 = vld [vmem:[#allocation5 + $0x38] sm:$0xff]  ;;  %v143_v8 = vpack.c.bf16 %v41_v5, %v39_v3  ;;  %v43_v10 = vld [vmem:[#allocation5 + $0x20] sm:$0xff]  ;;  %v45_v11 = vld [vmem:[#allocation5 + $0x30] sm:$0xff]  ;;  %s130_s6 = sshll.u32 %s232_s1, 4  ;;  %s131_s6 = int_to_ptr.vmem [resolvable:$true] %s130_s6 }
  0x29   :  { %v145_v9 = vpack.c.bf16 %v46_v7, %v44_v6  ;;  %142 = vmatprep.subr.bf16.mxu0 %v141_v4  ;;  %v147_v12 = vpack.c.bf16 %v45_v11, %v43_v10  ;;  %v38_v13 = vld [vmem:[#allocation2] sm:$0xff]  ;;  %s199_s7 = scalar_lea.vmem %s131_s6, 256  ;;  %p204_p3 = scmp.lt.s32.totalorder %s131_s6, %s131_s6 }
  0x2a   :  { %144 = vmatpush1.bf16.msra.mxu0 %v143_v8  ;;  %p200_p2 = scmp.ne.s32.totalorder %s131_s6, %s199_s7  ;;  %p205_p4 = scmp.lt.s32.totalorder %s199_s7, %s199_s7 }
  0x2b   :  { %146 = vmatprep.subr.bf16.mxu0 %v145_v9 }
  0x2c   :  { %p206_p5 = por %p205_p4, %p204_p3 }
  0x2e   :  { %148 = vmatpush1.bf16.msra.mxu0 %v147_v12  ;;  %p207_p6 = pnand %p206_p5, %p200_p2 }
  0x31   :  { %140 = vmatmul.mubr.msk.f32.vlgmr.msra.gmra.mrb[0].mxu0 %vm47_vm0, %v38_v13 }
 0x104   :  { %v117_v14 = vpop.f32.mrb[0].mxu0 }
 0x105   :  { %122 = vst [vmem:[#allocation7] sm:$0xff] %v117_v14  ;;  %v119_v15 = vpop.f32.mrb[1].mxu0 }
 0x106   :  { %123 = vst [vmem:[#allocation7 + $0x8] sm:$0xff] %v119_v15 }
 0x107   :  { %210 = shalt.err (!%p207_p6)
}
 0x108   :  { %s211_s10 = scalar_lea.hbm %s293_s2, 256 }
 0x109   :  { %p212_p7 = scmp.ne.s32.totalorder %s293_s2, %s211_s10  ;;  %p215_p8 = scmp.lt.u32.totalorder %s211_s10, %s293_s2 }
 0x10b   :  { %p217_p9 = pnand %p215_p8, %p212_p7 }
 0x10d   :  { %220 = shalt.err (!%p217_p9)
}
 0x10e   :  { %133 = dma.vmem_to_hbm [thread:$0]  %s131_s6, 256, %s293_s2, [#allocation4]  }
 0x10f   :  { %225 = dma.done.wait [#allocation4], 256  }
 0x110   :  { %226 = vsyncadd [#allocation4], 4294967040 }
 0x111   :  { %137 = vsyncpa [#allocation3], 1 }
 0x112   :  { %138 = vsyncpa [#allocation6], 1 }
 0x113   :  { %139 = vsyncpa [#allocation4], 1 }

</bundles_post_ra>
